<compile_context>
chip_gen: v5e
topology: v5e:2x2
jax: 0.10.0
libtpu: 0.0.40
codegen_flags: <defaults>
</compile_context>

<pallas_src>
import math

import jax
import jax.numpy as jnp
from jax.experimental import pallas as pl
from jax.experimental.pallas import tpu as pltpu


def _round_up(x, m):
    return ((x + m - 1) // m) * m


def _pad2(a, rows, cols):
    r, c = a.shape
    if r == rows and c == cols:
        return a
    return jnp.pad(a, ((0, rows - r), (0, cols - c)))


def mlp_kernel(x_ref, w1_ref, b1_ref, w2_ref, b2_ref, o_ref, acc_ref):
    """One (batch_tile x hidden_chunk) grid step of relu(x@W1+b1)@W2 + b2."""
    c = pl.program_id(1)

    @pl.when(c == 0)
    def _():
        acc_ref[...] = jnp.zeros_like(acc_ref)

    # fc1 chunk: compute-dtype operands (bf16 by default), f32 accumulation on the MXU.
    h = jnp.dot(x_ref[...].astype(w1_ref.dtype), w1_ref[...],
                preferred_element_type=jnp.float32)
    # Bias + ReLU in f32 on the VPU.  ReLU acts per hidden unit, so hidden chunking is exact.
    h = jnp.maximum(h + b1_ref[...], 0.0)
    # fc2 chunk: accumulate into the f32 scratch (sum over hidden chunks).
    acc_ref[...] += jnp.dot(h.astype(w2_ref.dtype), w2_ref[...],
                            preferred_element_type=jnp.float32)

    @pl.when(c == pl.num_programs(1) - 1)
    def _():
        o_ref[...] = (acc_ref[...] + b2_ref[...]).astype(o_ref.dtype)


def prepare_mlp_params(w1, b1, w2, b2, compute_dtype=jnp.bfloat16):
    """One-time pad + cast of the MLP parameters.  Call at init, NOT per forward.

    Layout: w1 is (in_dim, hidden), w2 is (hidden, out_dim) -- transposed vs. PyTorch's
    nn.Linear (out, in) -- so the kernel computes x @ W on the MXU.

    compute_dtype=jnp.bfloat16 (default) uses bf16 matmul operands with f32 accumulation
    (full-rate MXU).  Pass compute_dtype=jnp.float32 if exact f32 parity with the PyTorch
    module is required (the bf16 error grows with in_dim / hidden_dim).
    """
    in_dim, hidden = w1.shape
    out_dim = w2.shape[1]
    # Lane-dense padding; 256-aligned when the real dim allows (256-wide MXU on v6e/v7x).
    hid_p = _round_up(hidden, 256 if hidden >= 256 else 128)
    out_p = _round_up(out_dim, 256 if out_dim >= 256 else 128)

    b1 = jnp.reshape(b1, (1, hidden))
    b2 = jnp.reshape(b2, (1, out_dim))

    # Zero padding is exact: padded hidden columns give relu(0 + 0) = 0 and the matching
    # zero rows of W2 contribute 0; padded output columns are sliced off after the call.
    return {
        "w1": _pad2(w1, in_dim, hid_p).astype(compute_dtype),
        "b1": _pad2(b1, 1, hid_p).astype(jnp.float32),
        "w2": _pad2(w2, hid_p, out_p).astype(compute_dtype),
        "b2": _pad2(b2, 1, out_p).astype(jnp.float32),
        "out_dim": out_dim,
    }


def _vmem_budget_bytes():
    cap = 64 << 20  # conservative default = v7x physical VMEM per TensorCore
    try:
        cap = int(getattr(pltpu.get_tpu_info(), "vmem_capacity_bytes", cap))
    except Exception:
        pass  # hardware query unavailable (e.g. interpret mode) -> keep conservative default
    # Leave headroom for compiler-internal scratch and f32 intermediates (v7x: 64 -> 48 MiB;
    # v5e/v6e: 128 -> 112 MiB, well above their default scoped limits).
    return max(24 << 20, cap - (16 << 20))


def _footprint_bytes(batch_tile, in_dim, hid_chunk, out_p, x_bytes, w_bytes, out_bytes):
    x_tile = 2 * batch_tile * in_dim * x_bytes      # double-buffered (streams over batch)
    w1_tile = 2 * in_dim * hid_chunk * w_bytes      # double-buffered (streams over chunks)
    b1_tile = 2 * hid_chunk * 4
    w2_tile = 2 * hid_chunk * out_p * w_bytes
    b2_tile = 2 * out_p * 4
    out_tile = 2 * batch_tile * out_p * out_bytes
    acc = batch_tile * out_p * 4                    # f32 accumulator scratch
    h_tmp = batch_tile * hid_chunk * 4              # f32 fc1 intermediate
    return x_tile + w1_tile + b1_tile + w2_tile + b2_tile + out_tile + acc + h_tmp


def _pick_tiles(B, in_dim, hid_p, out_p, x_bytes, w_bytes, out_bytes, tile_budget,
                batch_tile=None, hidden_chunk=None):
    def fits(bt, hc):
        return _footprint_bytes(bt, in_dim, hc, out_p, x_bytes, w_bytes, out_bytes) <= tile_budget

    # Hidden-chunk candidates: lane-aligned divisors of hid_p, largest first (>= 256 preferred
    # so the fc1 N dim feeds the full 256-wide MXU on v6e/v7x).
    cands = [c for c in (2048, 1024, 768, 512, 384, 256, 128)
             if c <= hid_p and hid_p % c == 0]
    if hid_p <= 2048 and hid_p not in cands:
        cands.insert(0, hid_p)

    # Batch tile: single grid step for small batches (no artificial splits that shrink the
    # MXU M dim); target 512 rows otherwise so weight-chunk DMAs are well amortized.
    bt = batch_tile if batch_tile is not None else (B if B <= 512 else 512)
    while True:
        if hidden_chunk is not None:
            hc = hidden_chunk
        else:
            hc = next((c for c in cands if fits(bt, c)), cands[-1])
        if fits(bt, hc) or bt <= 8 or batch_tile is not None:
            return bt, hc
        bt = max(8, (bt // 2) // 8 * 8)  # only split the batch if VMEM forces it


def mlp_forward(x, params, *, out_dtype=None, batch_tile=None, hidden_chunk=None):
    """relu(x @ W1 + b1) @ W2 + b2, fused in a single Pallas TPU kernel.

    `params` must come from prepare_mlp_params().  Pass out_dtype=jnp.bfloat16 to halve the
    output HBM write when the consumer accepts bf16.
    """
    w1_p, b1_p, w2_p, b2_p = params["w1"], params["b1"], params["w2"], params["b2"]
    out_dim = params["out_dim"]
    in_dim, hid_p = w1_p.shape
    out_p = w2_p.shape[1]

    if x.ndim != 2 or x.shape[1] != in_dim:
        raise ValueError(f"x must be (batch, {in_dim}); got {x.shape}")
    B = x.shape[0]
    out_dtype = jnp.dtype(out_dtype if out_dtype is not None else x.dtype)

    x_bytes = jnp.dtype(x.dtype).itemsize
    w_bytes = jnp.dtype(w1_p.dtype).itemsize
    out_bytes = out_dtype.itemsize

    budget = _vmem_budget_bytes()
    batch_tile, hid_chunk = _pick_tiles(
        B, in_dim, hid_p, out_p, x_bytes, w_bytes, out_bytes,
        tile_budget=budget - (8 << 20),
        batch_tile=batch_tile, hidden_chunk=hidden_chunk)

    if hid_chunk % 128 or hid_p % hid_chunk:
        raise ValueError(f"hidden_chunk={hid_chunk} must be a multiple of 128 dividing {hid_p}")

    B_p = _round_up(B, batch_tile)
    if B_p != batch_tile and batch_tile % 8:
        raise ValueError(f"batch_tile={batch_tile} must be a multiple of 8 (or the full batch)")
    x_p = _pad2(x, B_p, in_dim) if B_p != B else x  # rows only; feature dim stays unpadded

    grid = (B_p // batch_tile, hid_p // hid_chunk)

    cost = pl.CostEstimate(
        flops=2 * B_p * hid_p * (in_dim + out_p),
        transcendentals=0,
        bytes_accessed=(B_p * in_dim * x_bytes
                        + grid[0] * (in_dim * hid_p + hid_p * out_p) * w_bytes
                        + grid[0] * (hid_p + out_p) * 4
                        + B_p * out_p * out_bytes),
    )

    # Note on v7x: for small batches grid[0] == 1, so the "parallel" batch axis never forces
    # both TensorCores to pull their own copy of the weights; for large batches the kernel is
    # compute-bound and batch sharding across the 2 TCs is the right split.
    out_padded = pl.pallas_call(
        mlp_kernel,
        out_shape=jax.ShapeDtypeStruct((B_p, out_p), out_dtype),
        grid_spec=pltpu.PrefetchScalarGridSpec(
            num_scalar_prefetch=0,
            grid=grid,
            in_specs=[
                pl.BlockSpec((batch_tile, in_dim), lambda i, c: (i, 0)),  # x tile (per batch step)
                pl.BlockSpec((in_dim, hid_chunk), lambda i, c: (0, c)),   # W1 chunk (streamed)
                pl.BlockSpec((1, hid_chunk), lambda i, c: (0, c)),        # b1 chunk
                pl.BlockSpec((hid_chunk, out_p), lambda i, c: (c, 0)),    # W2 chunk (streamed)
                pl.BlockSpec((1, out_p), lambda i, c: (0, 0)),            # b2
            ],
            out_specs=pl.BlockSpec((batch_tile, out_p), lambda i, c: (i, 0)),
            scratch_shapes=[pltpu.VMEM((batch_tile, out_p), jnp.float32)],
        ),
        compiler_params=pltpu.CompilerParams(
            dimension_semantics=("parallel", "arbitrary"),
            vmem_limit_bytes=int(budget),
        ),
        cost_estimate=cost,
    )(x_p, w1_p, b1_p, w2_p, b2_p)

    return out_padded[:B, :out_dim]


def init_linear_params(key, in_features, out_features, dtype=jnp.float32):
    """Deterministic init mimicking PyTorch nn.Linear defaults (kaiming-uniform)."""
    k_w, k_b = jax.random.split(key)
    bound_w = math.sqrt(1.0 / in_features) * math.sqrt(3.0)  # kaiming_uniform(a=sqrt(5))
    # Weight stored already transposed: (in_features, out_features).
    w = jax.random.uniform(k_w, (in_features, out_features), dtype,
                           minval=-bound_w, maxval=bound_w)
    bound_b = 1.0 / math.sqrt(in_features)
    b = jax.random.uniform(k_b, (out_features,), dtype, minval=-bound_b, maxval=bound_b)
    return w, b


if __name__ == "__main__":
    # Small shapes consistent with the MLP module.
    input_dim, hidden_dim, output_dim = 32, 64, 16
    batch = 64

    key = jax.random.PRNGKey(0)
    k_x, k_fc1, k_fc2 = jax.random.split(key, 3)

    x = jax.random.normal(k_x, (batch, input_dim), jnp.float32)
    w1, b1 = init_linear_params(k_fc1, input_dim, hidden_dim)
    w2, b2 = init_linear_params(k_fc2, hidden_dim, output_dim)

    params = prepare_mlp_params(w1, b1, w2, b2)          # one-time pad + bf16 cast
    out = jax.block_until_ready(mlp_forward(x, params))  # single (64, ...) grid step
    assert out.shape == (batch, output_dim)
    assert out.dtype == x.dtype

    bf = jnp.bfloat16

    def ref_bf16(xv, w1v, b1v, w2v, b2v):
        # Same numerics as the kernel: bf16 operands, f32 accumulation, f32 bias/ReLU.
        h = jnp.maximum(
            jnp.dot(xv.astype(bf), w1v.astype(bf), preferred_element_type=jnp.float32) + b1v,
            0.0)
        return jnp.dot(h.astype(bf), w2v.astype(bf), preferred_element_type=jnp.float32) + b2v

    ref = ref_bf16(x, w1, b1, w2, b2)
    assert jnp.allclose(out, ref, atol=5e-3, rtol=5e-3), float(jnp.max(jnp.abs(out - ref)))

    # Looser check against the exact f32 semantics of the PyTorch module (bf16 operands are an
    # intentional trade-off; pass compute_dtype=jnp.float32 to prepare_mlp_params for parity).
    ref_f32 = jnp.maximum(x @ w1 + b1, 0.0) @ w2 + b2
    assert jnp.allclose(out, ref_f32, atol=1e-1, rtol=1e-1)

    # Also exercise the hidden-dim accumulator path (multiple "arbitrary" grid steps).
    hidden2 = 256
    w1b, b1b = init_linear_params(jax.random.PRNGKey(1), input_dim, hidden2)
    w2b, b2b = init_linear_params(jax.random.PRNGKey(2), hidden2, output_dim)
    params2 = prepare_mlp_params(w1b, b1b, w2b, b2b)
    x2 = x[:24]
    out2 = jax.block_until_ready(mlp_forward(x2, params2, hidden_chunk=128))
    ref2 = ref_bf16(x2, w1b, b1b, w2b, b2b)
    assert out2.shape == (24, output_dim)
    assert jnp.allclose(out2, ref2, atol=5e-3, rtol=5e-3), float(jnp.max(jnp.abs(out2 - ref2)))

    print("KERNEL_OK")
</pallas_src>

<mosaic_0001>
module attributes {stable_mosaic.version = 11 : i64} {
  func.func @mlp_kernel(%arg0: i32, %arg1: i32, %arg2: memref<64x32xf32, #tpu.memory_space<vmem>>, %arg3: memref<32x128xbf16, #tpu.memory_space<vmem>>, %arg4: memref<1x128xf32, #tpu.memory_space<vmem>>, %arg5: memref<128x128xbf16, #tpu.memory_space<vmem>>, %arg6: memref<1x128xf32, #tpu.memory_space<vmem>>, %arg7: memref<64x128xf32, #tpu.memory_space<vmem>>, %arg8: memref<64x128xf32, #tpu.memory_space<vmem>>) attributes {dimension_semantics = [#tpu.dimension_semantics<parallel>, #tpu.dimension_semantics<arbitrary>], iteration_bounds = array<i64: 1, 1>, scalar_prefetch = 0 : i64, scratch_operands = 1 : i64, tpu.core_type = #tpu.core_type<tc>, window_params = [{transform_indices = @transform_0, window_bounds = array<i64: 64, 32>}, {transform_indices = @transform_1, window_bounds = array<i64: 32, 128>}, {transform_indices = @transform_2, window_bounds = array<i64: 1, 128>}, {transform_indices = @transform_3, window_bounds = array<i64: 128, 128>}, {pipeline_mode = #tpu.pipeline_mode<synchronous>, transform_indices = @transform_4, window_bounds = array<i64: 1, 128>}, {transform_indices = @transform_5, window_bounds = array<i64: 64, 128>}]} {
    %c0_i32 = arith.constant 0 : i32
    %0 = arith.cmpi eq, %arg1, %c0_i32 : i32
    %1 = arith.extui %0 : i1 to i32
    %c0_i32_0 = arith.constant 0 : i32
    %2 = arith.cmpi ne, %1, %c0_i32_0 : i32
    scf.if %2 {
      %cst_16 = arith.constant 0.000000e+00 : f32
      %21 = vector.broadcast %cst_16 : f32 to vector<64x128xf32>
      %c0_17 = arith.constant 0 : index
      %c0_18 = arith.constant 0 : index
      %22 = vector.load %arg8[%c0_17, %c0_18] : memref<64x128xf32, #tpu.memory_space<vmem>>, vector<64x128xf32>
      tpu.vector_store %arg8[%c0_17, %c0_18], %21 {strides = array<i32>} : memref<64x128xf32, #tpu.memory_space<vmem>>, vector<64x128xf32>,
    } else {
    }
    %c0 = arith.constant 0 : index
    %c0_1 = arith.constant 0 : index
    %3 = vector.load %arg2[%c0, %c0_1] : memref<64x32xf32, #tpu.memory_space<vmem>>, vector<64x32xf32>
    %4 = arith.truncf %3 : vector<64x32xf32> to vector<64x32xbf16>
    %c0_2 = arith.constant 0 : index
    %c0_3 = arith.constant 0 : index
    %5 = vector.load %arg3[%c0_2, %c0_3] : memref<32x128xbf16, #tpu.memory_space<vmem>>, vector<32x128xbf16>
    %cst = arith.constant dense<0.000000e+00> : vector<64x128xf32>
    %6 = tpu.matmul %4, %5, %cst {dimension_numbers = #tpu.dot_dimension_numbers<[1], [0], [0], [1], [0, 0, 1, 1], [], []>} : vector<64x32xbf16>, vector<32x128xbf16>, vector<64x128xf32> -> vector<64x128xf32>
    %c0_4 = arith.constant 0 : index
    %c0_5 = arith.constant 0 : index
    %7 = vector.load %arg4[%c0_4, %c0_5] : memref<1x128xf32, #tpu.memory_space<vmem>>, vector<1x128xf32>
    %8 = vector.broadcast %7 : vector<1x128xf32> to vector<64x128xf32>
    %9 = arith.addf %6, %8 : vector<64x128xf32>
    %cst_6 = arith.constant 0.000000e+00 : f32
    %10 = vector.broadcast %cst_6 : f32 to vector<64x128xf32>
    %11 = arith.maximumf %9, %10 : vector<64x128xf32>
    %c0_7 = arith.constant 0 : index
    %c0_8 = arith.constant 0 : index
    %12 = vector.load %arg8[%c0_7, %c0_8] : memref<64x128xf32, #tpu.memory_space<vmem>>, vector<64x128xf32>
    %13 = arith.truncf %11 : vector<64x128xf32> to vector<64x128xbf16>
    %c0_9 = arith.constant 0 : index
    %c0_10 = arith.constant 0 : index
    %14 = vector.load %arg5[%c0_9, %c0_10] : memref<128x128xbf16, #tpu.memory_space<vmem>>, vector<128x128xbf16>
    %cst_11 = arith.constant dense<0.000000e+00> : vector<64x128xf32>
    %15 = tpu.matmul %13, %14, %cst_11 {dimension_numbers = #tpu.dot_dimension_numbers<[1], [0], [0], [1], [0, 0, 1, 1], [], []>} : vector<64x128xbf16>, vector<128x128xbf16>, vector<64x128xf32> -> vector<64x128xf32>
    %16 = arith.addf %12, %15 : vector<64x128xf32>
    %c0_12 = arith.constant 0 : index
    %c0_13 = arith.constant 0 : index
    %17 = vector.load %arg8[%c0_12, %c0_13] : memref<64x128xf32, #tpu.memory_space<vmem>>, vector<64x128xf32>
    tpu.vector_store %arg8[%c0_12, %c0_13], %16 {strides = array<i32>} : memref<64x128xf32, #tpu.memory_space<vmem>>, vector<64x128xf32>,
    %c0_i32_14 = arith.constant 0 : i32
    %18 = arith.cmpi eq, %arg1, %c0_i32_14 : i32
    %19 = arith.extui %18 : i1 to i32
    %c0_i32_15 = arith.constant 0 : i32
    %20 = arith.cmpi ne, %19, %c0_i32_15 : i32
    scf.if %20 {
      %c0_16 = arith.constant 0 : index
      %c0_17 = arith.constant 0 : index
      %21 = vector.load %arg8[%c0_16, %c0_17] : memref<64x128xf32, #tpu.memory_space<vmem>>, vector<64x128xf32>
      %c0_18 = arith.constant 0 : index
      %c0_19 = arith.constant 0 : index
      %22 = vector.load %arg6[%c0_18, %c0_19] : memref<1x128xf32, #tpu.memory_space<vmem>>, vector<1x128xf32>
      %23 = vector.broadcast %22 : vector<1x128xf32> to vector<64x128xf32>
      %24 = arith.addf %21, %23 : vector<64x128xf32>
      %c0_20 = arith.constant 0 : index
      %c0_21 = arith.constant 0 : index
      %25 = vector.load %arg7[%c0_20, %c0_21] : memref<64x128xf32, #tpu.memory_space<vmem>>, vector<64x128xf32>
      tpu.vector_store %arg7[%c0_20, %c0_21], %24 {strides = array<i32>} : memref<64x128xf32, #tpu.memory_space<vmem>>, vector<64x128xf32>,
    } else {
    }
    return
  }
  func.func @transform_0(%arg0: i32, %arg1: i32) -> (i32, i32) {
    %c0_i32 = arith.constant 0 : i32
    %c0_i32_0 = arith.constant 0 : i32
    return %arg0, %c0_i32 : i32, i32
  }
  func.func @transform_1(%arg0: i32, %arg1: i32) -> (i32, i32) {
    %c0_i32 = arith.constant 0 : i32
    %c0_i32_0 = arith.constant 0 : i32
    return %c0_i32, %arg1 : i32, i32
  }
  func.func @transform_2(%arg0: i32, %arg1: i32) -> (i32, i32) {
    %c0_i32 = arith.constant 0 : i32
    %c0_i32_0 = arith.constant 0 : i32
    return %c0_i32, %arg1 : i32, i32
  }
  func.func @transform_3(%arg0: i32, %arg1: i32) -> (i32, i32) {
    %c0_i32 = arith.constant 0 : i32
    %c0_i32_0 = arith.constant 0 : i32
    return %arg1, %c0_i32 : i32, i32
  }
  func.func @transform_4(%arg0: i32, %arg1: i32) -> (i32, i32) {
    %c0_i32 = arith.constant 0 : i32
    %c0_i32_0 = arith.constant 0 : i32
    %c0_i32_1 = arith.constant 0 : i32
    return %c0_i32, %c0_i32_0 : i32, i32
  }
  func.func @transform_5(%arg0: i32, %arg1: i32) -> (i32, i32) {
    %c0_i32 = arith.constant 0 : i32
    %c0_i32_0 = arith.constant 0 : i32
    return %arg0, %c0_i32 : i32, i32
  }
}

</mosaic_0001>

<bundles_post_ra>
// kernel: tpu_custom_call.1
= control target key start
LH: loop header
LB: loop body
LE: loop exit
PB: predicated region body
PF: predicated region fallthrough
CT: control target
= control target key end

     0   :  { %s489_s0 = inlined_call_operand.vmem [shape: f32[64,32], index: 0, kind: input, shape index: {}]   ;;  %s490_s1 = inlined_call_operand.vmem [shape: bf16[32,128], index: 1, kind: input, shape index: {}]   ;;  %s491_s2 = inlined_call_operand.vmem [shape: f32[1,128], index: 2, kind: input, shape index: {}]   ;;  %s492_s3 = inlined_call_operand.vmem [shape: bf16[128,128], index: 3, kind: input, shape index: {}]   ;;  %s493_s4 = inlined_call_operand.vmem [shape: f32[1,128], index: 4, kind: input, shape index: {}]   ;;  %s494_s5 = inlined_call_operand.hbm [shape: f32[64,128], index: 5, kind: output, shape index: {}]  }
   0x1   :  { %v331_v0 = vld [vmem:[%s490_s1 + $0x8] sm:$0xff]  ;;  %v330_v1 = vld [vmem:[%s490_s1] sm:$0xff]  ;;  %v36_v2 = vld [vmem:[%s489_s0 + $0x10] sm:$0xff] }
   0x2   :  { %340 = vmatpush.bf16.msra.mxu3 %v331_v0  ;;  %v37_v3 = vld [vmem:[%s489_s0 + $0x18] sm:$0xff]  ;;  %85 = vmatpush.bf16.msra.mxu0 %v331_v0  ;;  %v34_v4 = vld [vmem:[%s489_s0] sm:$0xff]  ;;  %v35_v5 = vld [vmem:[%s489_s0 + $0x8] sm:$0xff] }
   0x3   :  { %10 = vsyncpa [#allocation4], 0  ;;  %v43_v6 = vpack.c.bf16 %v37_v3, %v36_v2  ;;  %v42_v7 = vpack.c.bf16 %v35_v5, %v34_v4  ;;  %vm66_vm0 = vcmask 261120   ;;  %v339_v8 = vld [vmem:[%s492_s3 + $0x38] sm:$0xff]  ;;  %v338_v9 = vld [vmem:[%s492_s3 + $0x30] sm:$0xff]  ;;  %s274_s6 = sshll.u32 %s494_s5, 4  ;;  %s275_s6 = int_to_ptr.hbm [resolvable:$true] %s274_s6 }
   0x4   :  { %342 = vmatpush.bf16.msra.mxu1 %v339_v8  ;;  %343 = vmatpush.bf16.msra.mxu2 %v339_v8  ;;  %v337_v10 = vld [vmem:[%s492_s3 + $0x28] sm:$0xff]  ;;  %v38_v11 = vld [vmem:[%s489_s0 + $0x20] sm:$0xff]  ;;  %v40_v15 = vld [vmem:[%s489_s0 + $0x30] sm:$0xff]  ;;  %s390_s7 = smov 128   ;;  %s391_s8 = smov 8  }
   0x5   :  { %v39_v12 = vld [vmem:[%s489_s0 + $0x28] sm:$0xff]  ;;  %v336_v13 = vld [vmem:[%s492_s3 + $0x20] sm:$0xff]  ;;  %v41_v16 = vld [vmem:[%s489_s0 + $0x38] sm:$0xff] }
   0x6   :  { %341 = vmatpush.bf16.msra.mxu3 %v330_v1  ;;  %86 = vmatpush.bf16.msra.mxu0 %v330_v1  ;;  %v44_v14 = vpack.c.bf16 %v39_v12, %v38_v11  ;;  %v45_v17 = vpack.c.bf16 %v41_v16, %v40_v15  ;;  %v335_v18 = vld [vmem:[%s492_s3 + $0x18] sm:$0xff]  ;;  %v334_v19 = vld [vmem:[%s492_s3 + $0x10] sm:$0xff]  ;;  %v333_v20 = vld [vmem:[%s492_s3 + $0x8] sm:$0xff] }
   0x7   :  { %v332_v21 = vld [vmem:[%s492_s3] sm:$0xff] }
   0x8   :  { %344 = vmatpush.bf16.msra.mxu1 %v338_v9  ;;  %345 = vmatpush.bf16.msra.mxu2 %v338_v9  ;;  %v361_v23 = vld [vmem:[%s491_s2] ss:$0 sm:$0xff] }
   0x9   :  { %295 = vmatmul.msk.bf16.vlgmr.msra.gmra.mxu3 %vm66_vm0, %v43_v6  ;;  %294 = vmatmul.msk.bf16.vlgmr.msra.gmra.mxu0 %vm66_vm0, %v42_v7  ;;  %v362_v51 = vld [vmem:[%s493_s4] ss:$0 sm:$0xff]  ;;  %s389_s4 = smov [#allocation3]  }
   0xa   :  { %192 = vmatpush.bf16.msrb.mxu0 %v339_v8  ;;  %s272_s29 = sshll.u32 %s389_s4, 4  ;;  %s273_s29 = int_to_ptr.vmem [resolvable:$true] %s272_s29 }
   0xc   :  { %346 = vmatpush.bf16.msra.mxu1 %v337_v10  ;;  %347 = vmatpush.bf16.msra.mxu2 %v337_v10 }
   0xe   :  { %193 = vmatpush.bf16.msrb.mxu0 %v338_v9 }
  0x10   :  { %348 = vmatpush.bf16.msra.mxu1 %v336_v13  ;;  %349 = vmatpush.bf16.msra.mxu2 %v336_v13 }
  0x12   :  { %194 = vmatpush.bf16.msrb.mxu0 %v337_v10 }
  0x14   :  { %350 = vmatpush.bf16.msra.mxu1 %v335_v18  ;;  %351 = vmatpush.bf16.msra.mxu2 %v335_v18 }
  0x16   :  { %195 = vmatpush.bf16.msrb.mxu0 %v336_v13 }
  0x18   :  { %352 = vmatpush.bf16.msra.mxu1 %v334_v19  ;;  %353 = vmatpush.bf16.msra.mxu2 %v334_v19 }
  0x19   :  { %296 = vmatmul.msk.bf16.gmra.mxu3 %vm66_vm0, %v44_v14 }
  0x1a   :  { %196 = vmatpush.bf16.msrb.mxu0 %v335_v18 }
  0x1c   :  { %354 = vmatpush.bf16.msra.mxu1 %v333_v20  ;;  %355 = vmatpush.bf16.msra.mxu2 %v333_v20 }
  0x1e   :  { %197 = vmatpush.bf16.msrb.mxu0 %v334_v19 }
  0x20   :  { %356 = vmatpush.bf16.msra.mxu1 %v332_v21  ;;  %357 = vmatpush.bf16.msra.mxu2 %v332_v21 }
  0x22   :  { %198 = vmatpush.bf16.msrb.mxu0 %v333_v20 }
  0x26   :  { %199 = vmatpush.bf16.msrb.mxu0 %v332_v21 }
  0x29   :  { %297 = vmatmul.msk.bf16.gmra.mxu3 %vm66_vm0, %v45_v17 }
  0x86   :  { %v88_v22 = vpop.f32.mrf.mxu0 }
  0x87   :  { %v89_v24 = vadd.f32 %v361_v23, %v88_v22 }
  0x89   :  { %v108_v27 = vmax.f32 %v89_v24, 0.0 }
  0x8c   :  { %v93_v25 = vpop.f32.mrf.mxu3 }
  0x8d   :  { %v94_v30 = vadd.f32 %v361_v23, %v93_v25 }
  0x8e   :  { %v90_v26 = vpop.f32.mrf.mxu0 }
  0x8f   :  { %v91_v28 = vadd.f32 %v361_v23, %v90_v26  ;;  %v110_v34 = vmax.f32 %v94_v30, 0.0 }
  0x91   :  { %v109_v29 = vmax.f32 %v91_v28, 0.0 }
  0x93   :  { %v124_v31 = vpack.c.bf16 %v109_v29, %v108_v27 }
  0x94   :  { %v95_v32 = vpop.f32.mrf.mxu3 }
  0x95   :  { %v96_v33 = vadd.f32 %v361_v23, %v95_v32  ;;  %200 = vmatmul.bf16.vlgmr.msrb.gmra.mxu0 %v124_v31 }
  0x97   :  { %v111_v35 = vmax.f32 %v96_v33, 0.0 }
  0x99   :  { %v125_v36 = vpack.c.bf16 %v111_v35, %v110_v34 }
  0x9b   :  { %205 = vmatmul.bf16.vlgmr.msra.gmra.mxu1 %v125_v36 }
  0x9c   :  { %v98_v37 = vpop.f32.mrf.mxu3 }
  0x9d   :  { %v99_v38 = vadd.f32 %v361_v23, %v98_v37 }
  0x9f   :  { %v112_v41 = vmax.f32 %v99_v38, 0.0 }
  0xa4   :  { %v100_v39 = vpop.f32.mrf.mxu3 }
  0xa5   :  { %v101_v40 = vadd.f32 %v361_v23, %v100_v39 }
  0xa7   :  { %v113_v42 = vmax.f32 %v101_v40, 0.0 }
  0xa9   :  { %v126_v43 = vpack.c.bf16 %v113_v42, %v112_v41 }
  0xab   :  { %210 = vmatmul.bf16.vlgmr.msra.gmra.mxu2 %v126_v43 }
  0xac   :  { %v103_v44 = vpop.f32.mrf.mxu3 }
  0xad   :  { %v104_v45 = vadd.f32 %v361_v23, %v103_v44 }
  0xaf   :  { %v114_v48 = vmax.f32 %v104_v45, 0.0 }
  0xb4   :  { %v105_v46 = vpop.f32.mrf.mxu3 }
  0xb5   :  { %v106_v47 = vadd.f32 %v361_v23, %v105_v46 }
  0xb7   :  { %v115_v49 = vmax.f32 %v106_v47, 0.0 }
  0xb9   :  { %v127_v50 = vpack.c.bf16 %v115_v49, %v114_v48 }
  0xbb   :  { %215 = vmatmul.bf16.gmra.mxu2 %v127_v50 }
 0x112   :  { %v201_v52 = vpop.f32.mrf.mxu0 }
 0x113   :  { %v252_v53 = vadd.f32 %v362_v51, %v201_v52 }
 0x115   :  { %260 = vst [vmem:[#allocation3] sm:$0xff] %v252_v53 }
 0x118   :  { %v206_v54 = vpop.f32.mrf.mxu1 }
 0x119   :  { %v254_v55 = vadd.f32 %v362_v51, %v206_v54 }
 0x11a   :  { %v203_v56 = vpop.f32.mrf.mxu0 }
 0x11b   :  { %262 = vst [vmem:[#allocation3 + $0x10] sm:$0xff] %v254_v55  ;;  %v253_v57 = vadd.f32 %v362_v51, %v203_v56 }
 0x11d   :  { %261 = vst [vmem:[#allocation3 + $0x8] sm:$0xff] %v253_v57 }
 0x120   :  { %v208_v58 = vpop.f32.mrf.mxu1 }
 0x121   :  { %v255_v59 = vadd.f32 %v362_v51, %v208_v58 }
 0x123   :  { %263 = vst [vmem:[#allocation3 + $0x18] sm:$0xff] %v255_v59 }
 0x12e   :  { %v211_v60 = vpop.f32.mrf.mxu2 }
 0x12f   :  { %v256_v61 = vadd.f32 %v362_v51, %v211_v60 }
 0x131   :  { %264 = vst [vmem:[#allocation3 + $0x20] sm:$0xff] %v256_v61 }
 0x136   :  { %v213_v62 = vpop.f32.mrf.mxu2 }
 0x137   :  { %v257_v63 = vadd.f32 %v362_v51, %v213_v62 }
 0x139   :  { %265 = vst [vmem:[#allocation3 + $0x28] sm:$0xff] %v257_v63 }
 0x13e   :  { %v216_v0 = vpop.f32.mrf.mxu2 }
 0x13f   :  { %v258_v1 = vadd.f32 %v362_v51, %v216_v0 }
 0x141   :  { %266 = vst [vmem:[#allocation3 + $0x30] sm:$0xff] %v258_v1 }
 0x146   :  { %v218_v2 = vpop.f32.mrf.mxu2 }
 0x147   :  { %v259_v3 = vadd.f32 %v362_v51, %v218_v2 }
 0x149   :  { %267 = vst [vmem:[#allocation3 + $0x38] sm:$0xff] %v259_v3 }
 0x14a   :  { %280 = dma.vmem_to_hbm [thread:$0]  %s273_s29, 1024, %s275_s6, [#allocation4], %s390_s7, %s390_s7, %s391_s8  }
 0x14b   :  { %387 = dma.done.wait [#allocation4], 1024  }
 0x14c   :  { %388 = vsyncadd [#allocation4], 4294966272 }
 0x14d   :  { %285 = vsyncpa [#allocation4], 1 }

</bundles_post_ra>
